<compile_context>
chip_gen: v5e
topology: v5e:2x2
jax: 0.10.0
libtpu: 0.0.40
codegen_flags: <defaults>
</compile_context>

<pallas_src>
import math

import jax
import jax.numpy as jnp
from jax import lax
from jax.experimental import pallas as pl
from jax.experimental.pallas import tpu as pltpu


def _cdiv(a, b):
    return -(-a // b)


def _choose_images_per_step(N, C, HW):
    """How many images to stack on the sublane axis of one grid step."""
    SUB = 8                                    # f32 sublanes per vreg
    base = SUB // math.gcd(C, SUB)             # smallest ips with ips*C % 8 == 0
    # VMEM budget: ~14 live (ips*C, HW) f32 tiles per step (2x-buffered in/out
    # blocks, the 3x column stack, conv temps).  Sized for the smallest scoped
    # default across v5e/v6e/v7x.
    budget = 12 * 1024 * 1024
    per_img = 14 * C * HW * 4
    max_ips = max(base, (budget // per_img) // base * base)
    ips = max(base, min(max_ips, (N // base) * base))
    if N > base:
        # Keep >= 2 grid steps so both v7x TensorCores get work.
        half = _cdiv(_cdiv(N, 2), base) * base
        ips = min(ips, max(base, half))
    return ips


def _pack_conv_weights(w, ips):
    """(C, C, 3, 3) OIHW -> (3, ips*C, 3*ips*C): one (R, 3R) matrix per kernel
    row kh; columns ordered (kw, image, c_in), block-diagonal over the images
    stacked into a grid step."""
    f32 = jnp.float32
    eye = jnp.eye(ips, dtype=f32)
    per_kh = []
    for kh in range(3):
        blocks = [jnp.kron(eye, w[:, :, kh, kw].astype(f32)) for kw in range(3)]
        per_kh.append(jnp.concatenate(blocks, axis=1))        # (R, 3R)
    return jnp.stack(per_kh, axis=0)                          # (3, R, 3R)


def _make_kernel(H, W):
    HW = H * W
    f32 = jnp.float32

    def _rot(v, shift):
        shift = shift % HW
        return v if shift == 0 else pltpu.roll(v, shift, axis=1)

    def kernel(x_ref, w1_ref, b1_ref, w2_ref, b2_ref, o_ref):
        # Per-tap validity masks (emulate the conv's zero padding), built once
        # per grid step from an iota -- no mask stream from HBM.
        lane_i = lax.broadcasted_iota(jnp.int32, (1, HW), 1)
        lane = lane_i.astype(f32)
        col = lane - jnp.floor((lane + 0.5) / W) * W       # p mod W, exact
        cm1 = (col >= 1.0).astype(f32)                     # col tap dc=-1 valid
        cp1 = (col <= W - 2.0).astype(f32)                 # col tap dc=+1 valid
        rm1 = (lane_i >= W).astype(f32)                    # row tap dr=-1 valid
        rp1 = (lane_i < (H - 1) * W).astype(f32)           # row tap dr=+1 valid

        def dot(w, s):
            return jnp.dot(w, s, preferred_element_type=f32,
                           precision=lax.Precision.HIGHEST)

        def conv3x3(v, w_ref):
            # Stack the 3 column taps (dc = -1, 0, +1) on the sublane axis,
            # then one K=3R dot per kernel row dr -- 3 dots/conv instead of 9.
            s = jnp.concatenate(
                [_rot(v, 1) * cm1, v, _rot(v, HW - 1) * cp1], axis=0)  # (3R,HW)
            acc = dot(w_ref[1], s)                                     # dr =  0
            acc = acc + dot(w_ref[0], _rot(s, W) * rm1)                # dr = -1
            acc = acc + dot(w_ref[2], _rot(s, HW - W) * rp1)           # dr = +1
            return acc

        xv = x_ref[...]                                    # (R, HW) f32
        y = jnp.maximum(conv3x3(xv, w1_ref) + b1_ref[...], 0.0)
        o_ref[...] = xv + conv3x3(y, w2_ref) + b2_ref[...]

    return kernel


@jax.jit
def res_block2d(x, w1, b1, w2, b2):
    """Res_Block2D forward: x + conv2(relu(conv1(x))).

    x: (N, C, H, W) float32.  w*: (C, C, 3, 3) OIHW.  b*: (C,).
    """
    N, C, H, W = x.shape
    HW = H * W
    f32 = jnp.float32

    ips = _choose_images_per_step(N, C, HW)     # images per grid step
    R = ips * C                                 # sublane rows per step
    G = _cdiv(N, ips)                           # grid steps ("parallel")

    # Free, metadata-only reshape: each grid step reads `ips` images' channels
    # as one (R, HW) tile straight out of the NCHW tensor.
    x2 = x.astype(f32).reshape(N * C, HW)

    w1p = _pack_conv_weights(w1, ips)
    w2p = _pack_conv_weights(w2, ips)
    b1r = jnp.tile(b1.astype(f32), ips).reshape(R, 1)
    b2r = jnp.tile(b2.astype(f32), ips).reshape(R, 1)

    # VMEM: ~14 live (R, HW) tiles + packed weights/biases, with headroom.
    est = (14 * R * HW + 2 * (9 * R * R + R)) * 4
    vmem_limit = int(min(max(4 * est, 16 * 2 ** 20), 64 * 2 ** 20))

    const = dict(pipeline_mode=pl.Buffered(1))  # single-buffer the constants
    out = pl.pallas_call(
        _make_kernel(H, W),
        out_shape=jax.ShapeDtypeStruct((N * C, HW), f32),
        grid=(G,),
        in_specs=[
            pl.BlockSpec((R, HW), lambda g: (g, 0)),
            pl.BlockSpec((3, R, 3 * R), lambda g: (0, 0, 0), **const),
            pl.BlockSpec((R, 1), lambda g: (0, 0), **const),
            pl.BlockSpec((3, R, 3 * R), lambda g: (0, 0, 0), **const),
            pl.BlockSpec((R, 1), lambda g: (0, 0), **const),
        ],
        out_specs=pl.BlockSpec((R, HW), lambda g: (g, 0)),
        compiler_params=pltpu.CompilerParams(
            dimension_semantics=("parallel",),
            vmem_limit_bytes=vmem_limit),
    )(x2, w1p, b1r, w2p, b2r)

    return out.reshape(N, C, H, W).astype(x.dtype)


def res_block2d_ref(x, w1, b1, w2, b2):
    """Pure-JAX reference matching the PyTorch forward pass."""
    dn = ("NCHW", "OIHW", "NCHW")
    prec = lax.Precision.HIGHEST
    y = lax.conv_general_dilated(x, w1, (1, 1), "SAME",
                                 dimension_numbers=dn, precision=prec)
    y = jnp.maximum(y + b1[None, :, None, None], 0.0)
    y = lax.conv_general_dilated(y, w2, (1, 1), "SAME",
                                 dimension_numbers=dn, precision=prec)
    return x + y + b2[None, :, None, None]


def init_params(key, nf):
    """Xavier-normal (gain=1.0) conv weights, zero biases (initialize_weights)."""
    k1, k2 = jax.random.split(key)
    fan = nf * 3 * 3
    std = math.sqrt(2.0 / (fan + fan))
    w1 = std * jax.random.normal(k1, (nf, nf, 3, 3), jnp.float32)
    w2 = std * jax.random.normal(k2, (nf, nf, 3, 3), jnp.float32)
    b1 = jnp.zeros((nf,), jnp.float32)
    b2 = jnp.zeros((nf,), jnp.float32)
    return w1, b1, w2, b2


if __name__ == "__main__":
    key = jax.random.PRNGKey(0)
    kx, kp = jax.random.split(key)

    N, C, H, W = 2, 4, 16, 16              # nf = 4
    x = jax.random.normal(kx, (N, C, H, W), jnp.float32)
    w1, b1, w2, b2 = init_params(kp, C)

    out = jax.block_until_ready(res_block2d(x, w1, b1, w2, b2))
    ref = jax.block_until_ready(res_block2d_ref(x, w1, b1, w2, b2))

    assert out.shape == (N, C, H, W)
    err = float(jnp.max(jnp.abs(out - ref)))
    assert jnp.allclose(out, ref, rtol=1e-4, atol=1e-4), f"max abs err = {err}"

    print("KERNEL_OK")
</pallas_src>

<mosaic_0001>
module attributes {stable_mosaic.version = 11 : i64} {
  func.func @kernel(%arg0: i32, %arg1: memref<8x256xf32, #tpu.memory_space<vmem>>, %arg2: memref<3x8x24xf32, #tpu.memory_space<vmem>>, %arg3: memref<8x1xf32, #tpu.memory_space<vmem>>, %arg4: memref<3x8x24xf32, #tpu.memory_space<vmem>>, %arg5: memref<8x1xf32, #tpu.memory_space<vmem>>, %arg6: memref<8x256xf32, #tpu.memory_space<vmem>>) attributes {dimension_semantics = [#tpu.dimension_semantics<parallel>], iteration_bounds = array<i64: 1>, scalar_prefetch = 0 : i64, scratch_operands = 0 : i64, tpu.core_type = #tpu.core_type<tc>, window_params = [{transform_indices = @transform_0, window_bounds = array<i64: 8, 256>}, {pipeline_mode = #tpu.pipeline_mode<synchronous>, transform_indices = @transform_1, window_bounds = array<i64: 3, 8, 24>}, {pipeline_mode = #tpu.pipeline_mode<synchronous>, transform_indices = @transform_2, window_bounds = array<i64: 8, 1>}, {pipeline_mode = #tpu.pipeline_mode<synchronous>, transform_indices = @transform_3, window_bounds = array<i64: 3, 8, 24>}, {pipeline_mode = #tpu.pipeline_mode<synchronous>, transform_indices = @transform_4, window_bounds = array<i64: 8, 1>}, {transform_indices = @transform_5, window_bounds = array<i64: 8, 256>}]} {
    %0 = tpu.iota {dimensions = array<i32: 1>} : vector<1x256xi32>
    %1 = arith.sitofp %0 : vector<1x256xi32> to vector<1x256xf32>
    %cst = arith.constant 5.000000e-01 : f32
    %2 = vector.broadcast %cst : f32 to vector<1x256xf32>
    %3 = arith.addf %1, %2 : vector<1x256xf32>
    %cst_0 = arith.constant 1.600000e+01 : f32
    %4 = vector.broadcast %cst_0 : f32 to vector<1x256xf32>
    %5 = arith.divf %3, %4 : vector<1x256xf32>
    %6 = math.floor %5 : vector<1x256xf32>
    %cst_1 = arith.constant 1.600000e+01 : f32
    %7 = vector.broadcast %cst_1 : f32 to vector<1x256xf32>
    %8 = arith.mulf %6, %7 : vector<1x256xf32>
    %9 = arith.subf %1, %8 : vector<1x256xf32>
    %cst_2 = arith.constant 1.000000e+00 : f32
    %10 = vector.broadcast %cst_2 : f32 to vector<1x256xf32>
    %11 = arith.cmpf oge, %9, %10 : vector<1x256xf32>
    %12 = arith.extui %11 : vector<1x256xi1> to vector<1x256xi32>
    %13 = arith.sitofp %12 : vector<1x256xi32> to vector<1x256xf32>
    %cst_3 = arith.constant 1.400000e+01 : f32
    %14 = vector.broadcast %cst_3 : f32 to vector<1x256xf32>
    %15 = arith.cmpf ole, %9, %14 : vector<1x256xf32>
    %16 = arith.extui %15 : vector<1x256xi1> to vector<1x256xi32>
    %17 = arith.sitofp %16 : vector<1x256xi32> to vector<1x256xf32>
    %c16_i32 = arith.constant 16 : i32
    %18 = vector.broadcast %c16_i32 : i32 to vector<1x256xi32>
    %19 = arith.cmpi sge, %0, %18 : vector<1x256xi32>
    %20 = arith.extui %19 : vector<1x256xi1> to vector<1x256xi32>
    %21 = arith.sitofp %20 : vector<1x256xi32> to vector<1x256xf32>
    %c240_i32 = arith.constant 240 : i32
    %22 = vector.broadcast %c240_i32 : i32 to vector<1x256xi32>
    %23 = arith.cmpi slt, %0, %22 : vector<1x256xi32>
    %24 = arith.extui %23 : vector<1x256xi1> to vector<1x256xi32>
    %25 = arith.sitofp %24 : vector<1x256xi32> to vector<1x256xf32>
    %c0 = arith.constant 0 : index
    %c0_4 = arith.constant 0 : index
    %26 = vector.load %arg1[%c0, %c0_4] : memref<8x256xf32, #tpu.memory_space<vmem>>, vector<8x256xf32>
    %c1_i32 = arith.constant 1 : i32
    %27 = tpu.dynamic_rotate %26 by %c1_i32 dim 1 : vector<8x256xf32>, i32 -> vector<8x256xf32>
    %28 = vector.broadcast %13 : vector<1x256xf32> to vector<8x256xf32>
    %29 = arith.mulf %27, %28 : vector<8x256xf32>
    %c255_i32 = arith.constant 255 : i32
    %30 = tpu.dynamic_rotate %26 by %c255_i32 dim 1 : vector<8x256xf32>, i32 -> vector<8x256xf32>
    %31 = vector.broadcast %17 : vector<1x256xf32> to vector<8x256xf32>
    %32 = arith.mulf %30, %31 : vector<8x256xf32>
    %33 = tpu.concatenate %29, %26, %32 in 0 : vector<8x256xf32>, vector<8x256xf32>, vector<8x256xf32> -> vector<24x256xf32>
    %c1 = arith.constant 1 : index
    %c0_5 = arith.constant 0 : index
    %c0_6 = arith.constant 0 : index
    %34 = vector.load %arg2[%c1, %c0_5, %c0_6] : memref<3x8x24xf32, #tpu.memory_space<vmem>>, vector<1x8x24xf32>
    %35 = vector.shape_cast %34 : vector<1x8x24xf32> to vector<8x24xf32>
    %cst_7 = arith.constant dense<0.000000e+00> : vector<8x256xf32>
    %36 = tpu.matmul %35, %33, %cst_7 {dimension_numbers = #tpu.dot_dimension_numbers<[1], [0], [0], [1], [0, 0, 1, 1], [], []>, precision = #tpu.contract_precision<fp32>} : vector<8x24xf32>, vector<24x256xf32>, vector<8x256xf32> -> vector<8x256xf32>
    %c0_8 = arith.constant 0 : index
    %c0_9 = arith.constant 0 : index
    %c0_10 = arith.constant 0 : index
    %37 = vector.load %arg2[%c0_8, %c0_9, %c0_10] : memref<3x8x24xf32, #tpu.memory_space<vmem>>, vector<1x8x24xf32>
    %38 = vector.shape_cast %37 : vector<1x8x24xf32> to vector<8x24xf32>
    %c16_i32_11 = arith.constant 16 : i32
    %39 = tpu.dynamic_rotate %33 by %c16_i32_11 dim 1 : vector<24x256xf32>, i32 -> vector<24x256xf32>
    %40 = vector.broadcast %21 : vector<1x256xf32> to vector<24x256xf32>
    %41 = arith.mulf %39, %40 : vector<24x256xf32>
    %cst_12 = arith.constant dense<0.000000e+00> : vector<8x256xf32>
    %42 = tpu.matmul %38, %41, %cst_12 {dimension_numbers = #tpu.dot_dimension_numbers<[1], [0], [0], [1], [0, 0, 1, 1], [], []>, precision = #tpu.contract_precision<fp32>} : vector<8x24xf32>, vector<24x256xf32>, vector<8x256xf32> -> vector<8x256xf32>
    %43 = arith.addf %36, %42 : vector<8x256xf32>
    %c2 = arith.constant 2 : index
    %c0_13 = arith.constant 0 : index
    %c0_14 = arith.constant 0 : index
    %44 = vector.load %arg2[%c2, %c0_13, %c0_14] : memref<3x8x24xf32, #tpu.memory_space<vmem>>, vector<1x8x24xf32>
    %45 = vector.shape_cast %44 : vector<1x8x24xf32> to vector<8x24xf32>
    %c240_i32_15 = arith.constant 240 : i32
    %46 = tpu.dynamic_rotate %33 by %c240_i32_15 dim 1 : vector<24x256xf32>, i32 -> vector<24x256xf32>
    %47 = vector.broadcast %25 : vector<1x256xf32> to vector<24x256xf32>
    %48 = arith.mulf %46, %47 : vector<24x256xf32>
    %cst_16 = arith.constant dense<0.000000e+00> : vector<8x256xf32>
    %49 = tpu.matmul %45, %48, %cst_16 {dimension_numbers = #tpu.dot_dimension_numbers<[1], [0], [0], [1], [0, 0, 1, 1], [], []>, precision = #tpu.contract_precision<fp32>} : vector<8x24xf32>, vector<24x256xf32>, vector<8x256xf32> -> vector<8x256xf32>
    %50 = arith.addf %43, %49 : vector<8x256xf32>
    %c0_17 = arith.constant 0 : index
    %c0_18 = arith.constant 0 : index
    %51 = vector.load %arg3[%c0_17, %c0_18] : memref<8x1xf32, #tpu.memory_space<vmem>>, vector<8x1xf32>
    %52 = vector.broadcast %51 : vector<8x1xf32> to vector<8x256xf32>
    %53 = arith.addf %50, %52 : vector<8x256xf32>
    %cst_19 = arith.constant 0.000000e+00 : f32
    %54 = vector.broadcast %cst_19 : f32 to vector<8x256xf32>
    %55 = arith.maximumf %53, %54 : vector<8x256xf32>
    %c1_i32_20 = arith.constant 1 : i32
    %56 = tpu.dynamic_rotate %55 by %c1_i32_20 dim 1 : vector<8x256xf32>, i32 -> vector<8x256xf32>
    %57 = vector.broadcast %13 : vector<1x256xf32> to vector<8x256xf32>
    %58 = arith.mulf %56, %57 : vector<8x256xf32>
    %c255_i32_21 = arith.constant 255 : i32
    %59 = tpu.dynamic_rotate %55 by %c255_i32_21 dim 1 : vector<8x256xf32>, i32 -> vector<8x256xf32>
    %60 = vector.broadcast %17 : vector<1x256xf32> to vector<8x256xf32>
    %61 = arith.mulf %59, %60 : vector<8x256xf32>
    %62 = tpu.concatenate %58, %55, %61 in 0 : vector<8x256xf32>, vector<8x256xf32>, vector<8x256xf32> -> vector<24x256xf32>
    %c1_22 = arith.constant 1 : index
    %c0_23 = arith.constant 0 : index
    %c0_24 = arith.constant 0 : index
    %63 = vector.load %arg4[%c1_22, %c0_23, %c0_24] : memref<3x8x24xf32, #tpu.memory_space<vmem>>, vector<1x8x24xf32>
    %64 = vector.shape_cast %63 : vector<1x8x24xf32> to vector<8x24xf32>
    %cst_25 = arith.constant dense<0.000000e+00> : vector<8x256xf32>
    %65 = tpu.matmul %64, %62, %cst_25 {dimension_numbers = #tpu.dot_dimension_numbers<[1], [0], [0], [1], [0, 0, 1, 1], [], []>, precision = #tpu.contract_precision<fp32>} : vector<8x24xf32>, vector<24x256xf32>, vector<8x256xf32> -> vector<8x256xf32>
    %c0_26 = arith.constant 0 : index
    %c0_27 = arith.constant 0 : index
    %c0_28 = arith.constant 0 : index
    %66 = vector.load %arg4[%c0_26, %c0_27, %c0_28] : memref<3x8x24xf32, #tpu.memory_space<vmem>>, vector<1x8x24xf32>
    %67 = vector.shape_cast %66 : vector<1x8x24xf32> to vector<8x24xf32>
    %c16_i32_29 = arith.constant 16 : i32
    %68 = tpu.dynamic_rotate %62 by %c16_i32_29 dim 1 : vector<24x256xf32>, i32 -> vector<24x256xf32>
    %69 = vector.broadcast %21 : vector<1x256xf32> to vector<24x256xf32>
    %70 = arith.mulf %68, %69 : vector<24x256xf32>
    %cst_30 = arith.constant dense<0.000000e+00> : vector<8x256xf32>
    %71 = tpu.matmul %67, %70, %cst_30 {dimension_numbers = #tpu.dot_dimension_numbers<[1], [0], [0], [1], [0, 0, 1, 1], [], []>, precision = #tpu.contract_precision<fp32>} : vector<8x24xf32>, vector<24x256xf32>, vector<8x256xf32> -> vector<8x256xf32>
    %72 = arith.addf %65, %71 : vector<8x256xf32>
    %c2_31 = arith.constant 2 : index
    %c0_32 = arith.constant 0 : index
    %c0_33 = arith.constant 0 : index
    %73 = vector.load %arg4[%c2_31, %c0_32, %c0_33] : memref<3x8x24xf32, #tpu.memory_space<vmem>>, vector<1x8x24xf32>
    %74 = vector.shape_cast %73 : vector<1x8x24xf32> to vector<8x24xf32>
    %c240_i32_34 = arith.constant 240 : i32
    %75 = tpu.dynamic_rotate %62 by %c240_i32_34 dim 1 : vector<24x256xf32>, i32 -> vector<24x256xf32>
    %76 = vector.broadcast %25 : vector<1x256xf32> to vector<24x256xf32>
    %77 = arith.mulf %75, %76 : vector<24x256xf32>
    %cst_35 = arith.constant dense<0.000000e+00> : vector<8x256xf32>
    %78 = tpu.matmul %74, %77, %cst_35 {dimension_numbers = #tpu.dot_dimension_numbers<[1], [0], [0], [1], [0, 0, 1, 1], [], []>, precision = #tpu.contract_precision<fp32>} : vector<8x24xf32>, vector<24x256xf32>, vector<8x256xf32> -> vector<8x256xf32>
    %79 = arith.addf %72, %78 : vector<8x256xf32>
    %80 = arith.addf %26, %79 : vector<8x256xf32>
    %c0_36 = arith.constant 0 : index
    %c0_37 = arith.constant 0 : index
    %81 = vector.load %arg5[%c0_36, %c0_37] : memref<8x1xf32, #tpu.memory_space<vmem>>, vector<8x1xf32>
    %82 = vector.broadcast %81 : vector<8x1xf32> to vector<8x256xf32>
    %83 = arith.addf %80, %82 : vector<8x256xf32>
    %c0_38 = arith.constant 0 : index
    %c0_39 = arith.constant 0 : index
    %84 = vector.load %arg6[%c0_38, %c0_39] : memref<8x256xf32, #tpu.memory_space<vmem>>, vector<8x256xf32>
    tpu.vector_store %arg6[%c0_38, %c0_39], %83 {strides = array<i32>} : memref<8x256xf32, #tpu.memory_space<vmem>>, vector<8x256xf32>,
    return
  }
  func.func @transform_0(%arg0: i32) -> (i32, i32) {
    %c0_i32 = arith.constant 0 : i32
    %c0_i32_0 = arith.constant 0 : i32
    return %arg0, %c0_i32 : i32, i32
  }
  func.func @transform_1(%arg0: i32) -> (i32, i32, i32) {
    %c0_i32 = arith.constant 0 : i32
    %c0_i32_0 = arith.constant 0 : i32
    %c0_i32_1 = arith.constant 0 : i32
    %c0_i32_2 = arith.constant 0 : i32
    return %c0_i32, %c0_i32_0, %c0_i32_1 : i32, i32, i32
  }
  func.func @transform_2(%arg0: i32) -> (i32, i32) {
    %c0_i32 = arith.constant 0 : i32
    %c0_i32_0 = arith.constant 0 : i32
    %c0_i32_1 = arith.constant 0 : i32
    return %c0_i32, %c0_i32_0 : i32, i32
  }
  func.func @transform_3(%arg0: i32) -> (i32, i32, i32) {
    %c0_i32 = arith.constant 0 : i32
    %c0_i32_0 = arith.constant 0 : i32
    %c0_i32_1 = arith.constant 0 : i32
    %c0_i32_2 = arith.constant 0 : i32
    return %c0_i32, %c0_i32_0, %c0_i32_1 : i32, i32, i32
  }
  func.func @transform_4(%arg0: i32) -> (i32, i32) {
    %c0_i32 = arith.constant 0 : i32
    %c0_i32_0 = arith.constant 0 : i32
    %c0_i32_1 = arith.constant 0 : i32
    return %c0_i32, %c0_i32_0 : i32, i32
  }
  func.func @transform_5(%arg0: i32) -> (i32, i32) {
    %c0_i32 = arith.constant 0 : i32
    %c0_i32_0 = arith.constant 0 : i32
    return %arg0, %c0_i32 : i32, i32
  }
}

</mosaic_0001>

<bundles_post_ra>
// kernel: tile.0
= control target key start
LH: loop header
LB: loop body
LE: loop exit
PB: predicated region body
PF: predicated region fallthrough
CT: control target
= control target key end

     0   :  { %s34_s8 = smov 125   ;;  %s35_s9 = smov 126   ;;  %vm7_vm0 = vcmask 7168   ;;  %s61_s0 = inlined_call_operand.vmem [shape: f32[2,4], index: 0, kind: input, shape index: {}]   ;;  %s62_s1 = inlined_call_operand.vmem [shape: f32[8,1], index: 1, kind: output, shape index: {}]  }
   0x1   :  { %v4_v0 = vld [vmem:[%s61_s0] sm:$0x3]  ;;  %s33_s0 = smov 127  }
   0x2   :  { %5 = vst [vmem:[#allocation0] sm:$0x3] %v4_v0 }
   0x9   :  { %v9_v1 = vld [vmem:[#allocation0] sm:$0x3]  }
   0xa   :  { %v21_v2 = vld [vmem:[#allocation0] sm:$0x3]   ;;  %10 = vrot.lane.b32.xlu0 %v9_v1, %s33_s0 }
   0xb   :  { %22 = vrot.lane.b32.xlu1 %v21_v2, %s34_s8  ;;  %v15_v3 = vld [vmem:[#allocation0] sm:$0x3]  }
   0xc   :  { %v6_v4 = vld [vmem:[#allocation0] sm:$0x3]  }
   0xd   :  { %8 = vst.msk [vmem:[%s62_s1] ss:$4 sm:$0x3] %vm7_vm0, %v6_v4  }
  0x12   :  { %16 = vrot.lane.b32.xlu0 %v15_v3, %s35_s9 }
  0x7c   :  { %v11_v5 = vpop.permute.xlu0 %10  }
  0x7d   :  { %v23_v6 = vpop.permute.xlu1 %22   ;;  %27 = vst.msk [vmem:[%s62_s1 + $0x1] ss:$4 sm:$0x3] %vm7_vm0, %v11_v5  }
  0x7e   :  { %29 = vst.msk [vmem:[%s62_s1 + $0x3] ss:$4 sm:$0x3] %vm7_vm0, %v23_v6  }
  0x84   :  { %v17_v7 = vpop.permute.xlu0 %16  }
  0x85   :  { %28 = vst.msk [vmem:[%s62_s1 + $0x2] ss:$4 sm:$0x3] %vm7_vm0, %v17_v7  }

// kernel: tile.13
= control target key start
LH: loop header
LB: loop body
LE: loop exit
PB: predicated region body
PF: predicated region fallthrough
CT: control target
= control target key end

     0   :  { %s22_s0 = inlined_call_operand.vmem [shape: f32[4], index: 0, kind: input, shape index: {}]   ;;  %s23_s1 = inlined_call_operand.vmem [shape: f32[2,4], index: 1, kind: output, shape index: {}]  }
   0x1   :  { %v4_v0 = vld [vmem:[%s22_s0] ss:$0 sm:$0xff] }
   0x2   :  { %5 = vst [vmem:[%s23_s1] sm:$0x3] %v4_v0 }

// kernel: res_block2d.1
= control target key start
LH: loop header
LB: loop body
LE: loop exit
PB: predicated region body
PF: predicated region fallthrough
CT: control target
= control target key end

     0   :  { %s2346_s20 = smov 1   ;;  %s2347_s21 = smov 127   ;;  %v2349_v2 = vmov 16.0   ;;  %v20_v4 = vlaneseq  ;;  %v2350_v26 = vmov 0.0   ;;  %vm114_vm9 = vcmask 195584   ;;  %s3106_s0 = inlined_call_operand.vmem [shape: f32[8,256], index: 0, kind: input, shape index: {}]   ;;  %s3107_s1 = inlined_call_operand.vmem [shape: f32[3,8,24], index: 1, kind: input, shape index: {}]   ;;  %s3108_s2 = inlined_call_operand.vmem [shape: f32[8,1], index: 2, kind: input, shape index: {}]   ;;  %s3109_s3 = inlined_call_operand.vmem [shape: f32[3,8,24], index: 3, kind: input, shape index: {}]   ;;  %s3110_s4 = inlined_call_operand.vmem [shape: f32[8,1], index: 4, kind: input, shape index: {}]   ;;  %s3111_s5 = inlined_call_operand.vmem [shape: f32[8,256], index: 5, kind: output, shape index: {}]  }
   0x1   :  { %v2386_v0 = vld [vmem:[%s3106_s0] sm:$0xff]  ;;  %v2395_v1 = vld [vmem:[%s3106_s0 + $0x8] sm:$0xff]  ;;  %s2348_s24 = smov 16   ;;  %2342 = vrcp.f32 %v2349_v2  ;;  %s2351_s25 = smov 112  }
   0x2   :  { %68 = vrot.lane.b32.xlu1 %v2386_v0, %s2346_s20  ;;  %77 = vrot.lane.b32.xlu0 %v2386_v0, %s2347_s21  ;;  %v2405_v6 = vand.u32 127, %v20_v4  ;;  %v88_v48 = vld [vmem:[%s3107_s1] sm:$0xff] }
   0x3   :  { %v116_v49 = vsel %vm114_vm9, %v88_v48, 0 }
   0x4   :  { %v2408_v8 = vadd.s32 128, %v2405_v6  ;;  %v23_v10 = vcvt.s32.f32 %v2405_v6  ;;  %vm72_vm3 = vcmp.lt.s32.totalorder %v2405_v6, 1  ;;  %vm81_vm4 = vcmp.lt.s32.totalorder %v2405_v6, 127 }
   0x5   :  { %vm54_vm7 = vcmp.ge.s32.totalorder %v2405_v6, 16  ;;  %vm101_vm8 = vcmp.lt.s32.totalorder %v2405_v6, 16  ;;  %v2486_v55 = vand.u32 4294901760, %v116_v49  ;;  %vm823_vm11 = vcmp.lt.s32.totalorder %v2405_v6, 112 }
   0x6   :  { %v24_v11 = vcvt.s32.f32 %v2408_v8  ;;  %v25_v13 = vadd.f32 0.5, %v23_v10  ;;  %v2471_v44 = vsel %vm54_vm7, 1.0, %v2350_v26  ;;  %vm61_vm10 = vcmp.lt.s32.totalorder %v2408_v8, 240 }
   0x7   :  { %v2343_v3 = vpop.eup %2342  ;;  %v2498_v61 = vsub.f32 %v116_v49, %v2486_v55 }
   0x8   :  { %v28_v5 = vmul.f32 16.0, %v2343_v3  ;;  %vm32_vm0 = vweird.f32 %v2343_v3  ;;  %v26_v14 = vadd.f32 0.5, %v24_v11 }
   0xa   :  { %70 = vrot.lane.b32.xlu1 %v2395_v1, %s2346_s20  ;;  %79 = vrot.lane.b32.xlu0 %v2395_v1, %s2347_s21  ;;  %v29_v7 = vsub.f32 1.0, %v28_v5  ;;  %v2506_v5 = vand.u32 4294901760, %v2498_v61 }
   0xc   :  { %v30_v9 = vmul.f32 %v2343_v3, %v29_v7 }
   0xe   :  { %v31_v12 = vadd.f32 %v2343_v3, %v30_v9 }
  0x10   :  { %v33_v15 = vsel %vm32_vm0, %v2343_v3, %v31_v12  ;;  %v140_v12 = vsub.f32 %v2498_v61, %v2506_v5 }
  0x11   :  { %v34_v16 = vmul.f32 %v33_v15, %v25_v13  ;;  %v35_v17 = vmul.f32 %v33_v15, %v26_v14 }
  0x12   :  { %97 = vrot.lane.b32.xlu1 %v2395_v1, %s2348_s24  ;;  %91 = vrot.lane.b32.xlu0 %v2386_v0, %s2348_s24 }
  0x13   :  { %v36_v18 = vfloor.f32 %v34_v16  ;;  %v37_v19 = vfloor.f32 %v35_v17 }
  0x15   :  { %v38_v20 = vmul.f32 16.0, %v36_v18  ;;  %v39_v21 = vmul.f32 16.0, %v37_v19 }
  0x17   :  { %v40_v24 = vsub.f32 %v23_v10, %v38_v20  ;;  %v41_v25 = vsub.f32 %v24_v11, %v39_v21  ;;  %v141_v21 = vand.u32 4294901760, %v140_v12 }
  0x19   :  { %vm43_vm1 = vcmp.ge.f32.partialorder %v41_v25, 1.0  ;;  %vm48_vm2 = vcmp.le.f32.partialorder %v40_v24, 14.0  ;;  %vm49_vm5 = vcmp.le.f32.partialorder %v41_v25, 14.0  ;;  %vm42_vm6 = vcmp.ge.f32.partialorder %v40_v24, 1.0 }
  0x1a   :  { %v2415_v27 = vsel %vm43_vm1, 1.0, %v2350_v26  ;;  %v2418_v28 = vsel %vm48_vm2, 1.0, %v2350_v26  ;;  %v2437_v35 = vsel %vm49_vm5, 1.0, %v2350_v26  ;;  %v2451_v38 = vsel %vm42_vm6, 1.0, %v2350_v26 }
  0x74   :  { %v69_v22 = vpop.permute.xlu1 %68  ;;  %v78_v23 = vpop.permute.xlu0 %77 }
  0x7c   :  { %v71_v29 = vpop.permute.xlu1 %70  ;;  %v80_v30 = vpop.permute.xlu0 %79 }
  0x7d   :  { %v73_v31 = vsel %vm72_vm3, %v69_v22, %v71_v29  ;;  %v82_v32 = vsel %vm81_vm4, %v78_v23, %v80_v30  ;;  %v83_v36 = vsel %vm81_vm4, %v80_v30, %v78_v23  ;;  %v74_v39 = vsel %vm72_vm3, %v71_v29, %v69_v22 }
  0x7e   :  { %v2425_v33 = vmul.f32 %v2415_v27, %v73_v31  ;;  %v2428_v34 = vmul.f32 %v2418_v28, %v82_v32  ;;  %v2442_v37 = vmul.f32 %v2437_v35, %v83_v36  ;;  %v2456_v40 = vmul.f32 %v2451_v38, %v74_v39  ;;  %v2329_v39 = vld [vmem:[%s3107_s1 + $0x8] sm:$0xff] }
  0x7f   :  { %v463_v48 = vsel %vm114_vm9, %v2329_v39, 0 }
  0x80   :  { %95 = vrot.lane.b32.xlu0 %v2425_v33, %s2348_s24  ;;  %815 = vrot.lane.b32.xlu1 %v2428_v34, %s2351_s25  ;;  %v2544_v49 = vand.u32 4294901760, %v2428_v34 }
  0x81   :  { %93 = vrot.lane.b32.xlu2 %v2428_v34, %s2348_s24 }
  0x84   :  { %v98_v41 = vpop.permute.xlu1 %97  ;;  %v92_v42 = vpop.permute.xlu0 %91 }
  0x85   :  { %v106_v43 = vsel %vm101_vm8, %v98_v41, %v92_v42  ;;  %v103_v59 = vsel %vm101_vm8, %v92_v42, %v98_v41 }
  0x86   :  { %v110_v46 = vmul.f32 %v2471_v44, %v106_v43  ;;  %v2500_v62 = vand.u32 4294901760, %v103_v59  ;;  %v2535_v43 = vand.u32 4294901760, %v2442_v37 }
  0x88   :  { %813 = vrot.lane.b32.xlu0 %v2386_v0, %s2351_s25  ;;  %819 = vrot.lane.b32.xlu1 %v2395_v1, %s2351_s25  ;;  %v2474_v47 = vand.u32 4294901760, %v110_v46  ;;  %v2509_v7 = vsub.f32 %v103_v59, %v2500_v62 }
  0x89   :  { %99 = vrot.lane.b32.xlu2 %v2442_v37, %s2348_s24 }
  0x8a   :  { %v166_v51 = vsub.f32 %v110_v46, %v2474_v47  ;;  %v339_v17 = vand.u32 4294901760, %v2509_v7  ;;  %v2539_v46 = vand.u32 4294901760, %v2395_v1 }
  0x8c   :  { %v167_v57 = vand.u32 4294901760, %v166_v51  ;;  %v340_v24 = vsub.f32 %v2509_v7, %v339_v17 }
  0x8e   :  { %v168_v2 = vsub.f32 %v166_v51, %v167_v57  ;;  %v341_v36 = vand.u32 4294901760, %v340_v24 }
  0x90   :  { %817 = vrot.lane.b32.xlu0 %v2425_v33, %s2351_s25  ;;  %v169_v10 = vand.u32 4294901760, %v168_v2 }
  0x91   :  { %89 = vrot.lane.b32.xlu2 %v2456_v40, %s2348_s24 }
  0x99   :  { %821 = vrot.lane.b32.xlu2 %v2442_v37, %s2351_s25 }
  0xa1   :  { %811 = vrot.lane.b32.xlu2 %v2456_v40, %s2351_s25 }
  0xdb   :  { %v94_v45 = vpop.permute.xlu2 %93 }
  0xe3   :  { %v100_v50 = vpop.permute.xlu2 %99 }
  0xe4   :  { %v107_v52 = vsel %vm101_vm8, %v100_v50, %v94_v45  ;;  %v104_v53 = vsel %vm101_vm8, %v94_v45, %v100_v50  ;;  %v2547_v50 = vand.u32 4294901760, %v2386_v0 }
  0xe5   :  { %v112_v54 = vmul.f32 %v2471_v44, %v107_v52  ;;  %v2490_v58 = vand.u32 4294901760, %v104_v53  ;;  %v2555_v52 = vand.u32 4294901760, %v463_v48 }
  0xe6   :  { %v513_v59 = vsub.f32 %v2386_v0, %v2547_v50 }
  0xe7   :  { %v2488_v56 = vand.u32 4294901760, %v112_v54  ;;  %v332_v3 = vsub.f32 %v104_v53, %v2490_v58  ;;  %v2558_v53 = vand.u32 4294901760, %v2425_v33 }
  0xe9   :  { %132 = vmatpush.msra.mxu0 %v2488_v56  ;;  %224 = vmatpush.msra.mxu3 %v2488_v56  ;;  %v160_v60 = vsub.f32 %v112_v54, %v2488_v56  ;;  %v333_v11 = vand.u32 4294901760, %v332_v3  ;;  %v2563_v54 = vand.u32 4294901760, %v2456_v40 }
  0xeb   :  { %197 = vmatpush.msra.mxu2 %v160_v60  ;;  %134 = vmatpush.msra.mxu0 %v2474_v47  ;;  %v161_v63 = vand.u32 4294901760, %v160_v60  ;;  %v90_v13 = vpop.permute.xlu2 %89  ;;  %v334_v20 = vsub.f32 %v332_v3, %v333_v11 }
  0xec   :  { %226 = vmatpush.msra.mxu3 %v2474_v47 }
  0xed   :  { %v162_v4 = vsub.f32 %v160_v60, %v161_v63  ;;  %200 = vmatpush.msra.mxu2 %v166_v51  ;;  %v335_v25 = vand.u32 4294901760, %v334_v20  ;;  %v2552_v51 = vsub.f32 %v2442_v37, %v2535_v43  ;;  %v507_v37 = vsub.f32 %v2428_v34, %v2544_v49 }
  0xee   :  { %v519_v34 = vsub.f32 %v2456_v40, %v2563_v54 }
  0xef   :  { %v163_v9 = vand.u32 4294901760, %v162_v4 }
  0xf1   :  { %164 = vmatpush.msra.mxu1 %v163_v9  ;;  %v520_v9 = vand.u32 4294901760, %v519_v34 }
  0xf2   :  { %v96_v14 = vpop.permute.xlu0 %95  ;;  %v816_v60 = vpop.permute.xlu1 %815 }
  0xf3   :  { %v102_v15 = vsel %vm101_vm8, %v90_v13, %v96_v14  ;;  %v105_v16 = vsel %vm101_vm8, %v96_v14, %v90_v13  ;;  %170 = vmatpush.msra.mxu1 %v169_v10  ;;  %v822_v4 = vpop.permute.xlu2 %821 }
  0xf4   :  { %v108_v18 = vmul.f32 %v2471_v44, %v105_v16  ;;  %v2519_v19 = vand.u32 4294901760, %v102_v15  ;;  %v2619_v16 = vsel %vm61_vm10, 1.0, %v2350_v26  ;;  %v826_v26 = vsel %vm823_vm11, %v816_v60, %v822_v4 }
  0xf6   :  { %v2521_v22 = vand.u32 4294901760, %v108_v18  ;;  %v344_v23 = vsub.f32 %v102_v15, %v2519_v19 }
  0xf8   :  { %136 = vmatpush.msra.mxu0 %v2521_v22  ;;  %228 = vmatpush.msra.mxu3 %v2521_v22  ;;  %v172_v29 = vsub.f32 %v108_v18, %v2521_v22  ;;  %v345_v30 = vand.u32 4294901760, %v344_v23 }
  0xf9   :  { %142 = vmatmul.f32.vlgmr.msra.gmra.mxu0 %v141_v21  ;;  %232 = vmatmul.f32.vlgmr.msra.gmra.mxu3 %v2506_v5 }
  0xfa   :  { %252 = vmatpush.msrb.mxu0 %v161_v63  ;;  %336 = vmatpush.msrb.mxu3 %v335_v25  ;;  %v173_v31 = vand.u32 4294901760, %v172_v29  ;;  %v346_v32 = vsub.f32 %v344_v23, %v345_v30  ;;  %v2579_v63 = vsub.f32 %v463_v48, %v2555_v52  ;;  %v814_v2 = vpop.permute.xlu0 %813  ;;  %v820_v14 = vpop.permute.xlu1 %819 }
  0xfb   :  { %203 = vmatpush.msra.mxu2 %v172_v29  ;;  %v828_v20 = vsel %vm823_vm11, %v820_v14, %v814_v2  ;;  %v812_v25 = vpop.permute.xlu2 %811 }
  0xfc   :  { %206 = vmatmul.f32.vlgmr.msra.gmra.mxu2 %v2498_v61  ;;  %256 = vmatpush.msrb.mxu0 %v167_v57  ;;  %v347_v41 = vand.u32 4294901760, %v346_v32  ;;  %v174_v42 = vsub.f32 %v172_v29, %v173_v31  ;;  %v2567_v57 = vsub.f32 %v2395_v1, %v2539_v46  ;;  %v680_v1 = vand.u32 4294901760, %v2552_v51 }
  0xfd   :  { %304 = vmatpush.msrb.mxu2 %v2490_v58  ;;  %342 = vmatpush.msrb.mxu3 %v341_v36  ;;  %v2640_v32 = vand.u32 4294901760, %v826_v26 }
  0xfe   :  { %260 = vmatpush.msrb.mxu0 %v173_v31  ;;  %v175_v45 = vand.u32 4294901760, %v174_v42  ;;  %v686_v0 = vand.u32 4294901760, %v2567_v57  ;;  %v681_v40 = vsub.f32 %v2552_v51, %v680_v1 }
  0xff   :  { %306 = vmatpush.msrb.mxu2 %v2500_v62  ;;  %348 = vmatpush.msrb.mxu3 %v347_v41 }
 0x100   :  { %369 = vmatpush.msra.mxu0 %v332_v3  ;;  %176 = vmatpush.msra.mxu1 %v175_v45  ;;  %v514_v3 = vand.u32 4294901760, %v513_v59 }
 0x101   :  { %452 = vmatpush.msra.mxu3 %v2490_v58  ;;  %308 = vmatpush.msrb.mxu2 %v2519_v19 }
 0x102   :  { %372 = vmatpush.msra.mxu0 %v2509_v7  ;;  %178 = vmatmul.f32.vlgmr.msra.gmra.mxu1 %v2486_v55  ;;  %v687_v7 = vsub.f32 %v2567_v57, %v686_v0  ;;  %v515_v12 = vsub.f32 %v513_v59, %v514_v3 }
 0x103   :  { %424 = vmatpush.msra.mxu2 %v333_v11  ;;  %262 = vmatmul.f32.vlgmr.msrb.gmra.mxu0 %v2486_v55 }
 0x104   :  { %280 = vmatpush.msrb.mxu1 %v2488_v56  ;;  %350 = vmatmul.f32.vlgmr.msrb.gmra.mxu3 %v2486_v55  ;;  %v2587_v56 = vsub.f32 %v2425_v33, %v2558_v53  ;;  %v2597_v33 = vand.u32 4294901760, %v2579_v63  ;;  %v688_v15 = vand.u32 4294901760, %v687_v7  ;;  %v516_v18 = vand.u32 4294901760, %v515_v12 }
 0x105   :  { %454 = vmatpush.msra.mxu3 %v2500_v62  ;;  %375 = vmatpush.msra.mxu0 %v344_v23 }
 0x106   :  { %428 = vmatpush.msra.mxu2 %v339_v17  ;;  %282 = vmatpush.msrb.mxu1 %v2474_v47  ;;  %v508_v47 = vand.u32 4294901760, %v507_v37  ;;  %v692_v10 = vand.u32 4294901760, %v2587_v56  ;;  %v487_v13 = vsub.f32 %v2579_v63, %v2597_v33 }
 0x107   :  { %314 = vmatmul.f32.vlgmr.msrb.gmra.mxu2 %v141_v21  ;;  %456 = vmatpush.msra.mxu3 %v2519_v19  ;;  %v818_v21 = vpop.permute.xlu0 %817 }
 0x108   :  { %479 = vmatpush.msrb.mxu0 %v2544_v49  ;;  %432 = vmatpush.msra.mxu2 %v345_v30  ;;  %v509_v11 = vsub.f32 %v507_v37, %v508_v47  ;;  %v693_v8 = vsub.f32 %v2587_v56, %v692_v10  ;;  %v833_v30 = vmul.f32 %v2619_v16, %v828_v20 }
 0x109   :  { %571 = vmatpush.msrb.mxu3 %v2544_v49  ;;  %284 = vmatpush.msrb.mxu1 %v2521_v22  ;;  %v488_v22 = vand.u32 4294901760, %v487_v13  ;;  %v827_v31 = vsel %vm823_vm11, %v818_v21, %v812_v25  ;;  %v824_v41 = vsel %vm823_vm11, %v812_v25, %v818_v21 }
 0x10a   :  { %481 = vmatpush.msrb.mxu0 %v2547_v50  ;;  %544 = vmatpush.msrb.mxu2 %v507_v37  ;;  %v510_v17 = vand.u32 4294901760, %v509_v11  ;;  %v694_v24 = vand.u32 4294901760, %v693_v8  ;;  %v831_v45 = vmul.f32 %v2619_v16, %v827_v31  ;;  %v2654_v48 = vand.u32 4294901760, %v833_v30 }
 0x10b   :  { %396 = vmatpush.msra.mxu1 %v2490_v58  ;;  %573 = vmatpush.msrb.mxu3 %v2547_v50  ;;  %v682_v58 = vand.u32 4294901760, %v681_v40  ;;  %v881_v37 = vsub.f32 %v826_v26, %v2640_v32 }
 0x10c   :  { %483 = vmatpush.msrb.mxu0 %v2563_v54  ;;  %547 = vmatpush.msrb.mxu2 %v513_v59  ;;  %v2659_v59 = vand.u32 4294901760, %v824_v41 }
 0x10d   :  { %398 = vmatpush.msra.mxu1 %v2500_v62  ;;  %575 = vmatpush.msrb.mxu3 %v2563_v54  ;;  %v521_v62 = vsub.f32 %v519_v34, %v520_v9 }
 0x10e   :  { %286 = vmatmul.f32.vlgmr.msrb.gmra.mxu1 %v2486_v55  ;;  %378 = vmatmul.f32.vlgmr.msra.gmra.mxu0 %v2498_v61  ;;  %v829_v61 = vsel %vm823_vm11, %v822_v4, %v816_v60 }
 0x10f   :  { %458 = vmatmul.f32.vlgmr.msra.gmra.mxu3 %v2486_v55  ;;  %550 = vmatpush.msrb.mxu2 %v519_v34  ;;  %v835_v23 = vmul.f32 %v2619_v16, %v829_v61  ;;  %v522_v29 = vand.u32 4294901760, %v521_v62  ;;  %v2672_v34 = vand.u32 4294901760, %v831_v45 }
 0x110   :  { %599 = vmatpush.msra.mxu0 %v508_v47  ;;  %683 = vmatpush.msra.mxu3 %v682_v58  ;;  %v893_v47 = vsub.f32 %v824_v41, %v2659_v59 }
 0x111   :  { %400 = vmatpush.msra.mxu1 %v2519_v19  ;;  %434 = vmatmul.f32.vlgmr.msra.gmra.mxu2 %v2486_v55  ;;  %v825_v19 = vsel %vm823_vm11, %v814_v2, %v820_v14  ;;  %v2330_v55 = vld [vmem:[%s3107_s1 + $0x10] sm:$0xff]  ;;  %v2644_v39 = vand.u32 4294901760, %v835_v23  ;;  %v2676_v2 = vsub.f32 %v833_v30, %v2654_v48 }
 0x112   :  { %603 = vmatpush.msra.mxu0 %v514_v3  ;;  %651 = vmatpush.msra.mxu2 %v2535_v43  ;;  %v2642_v36 = vand.u32 4294901760, %v825_v19  ;;  %v837_v42 = vsel %vm114_vm9, %v2330_v55, 0  ;;  %v894_v4 = vand.u32 4294901760, %v893_v47 }
 0x113   :  { %511 = vmatpush.msrb.mxu1 %v510_v17  ;;  %689 = vmatpush.msra.mxu3 %v688_v15  ;;  %v2664_v60 = vand.u32 4294901760, %v837_v42 }
 0x114   :  { %607 = vmatpush.msra.mxu0 %v520_v9  ;;  %653 = vmatpush.msra.mxu2 %v2539_v46  ;;  %v895_v11 = vsub.f32 %v893_v47, %v894_v4 }
 0x115   :  { %517 = vmatpush.msrb.mxu1 %v516_v18  ;;  %695 = vmatpush.msra.mxu3 %v694_v24 }
 0x116   :  { %489 = vmatmul.f32.vlgmr.msrb.gmra.mxu0 %v488_v22  ;;  %655 = vmatpush.msra.mxu2 %v2558_v53 }
 0x117   :  { %523 = vmatpush.msrb.mxu1 %v522_v29  ;;  %579 = vmatmul.f32.vlgmr.msrb.gmra.mxu3 %v2597_v33 }
 0x118   :  { %404 = vmatmul.f32.vlgmr.msra.gmra.mxu1 %v2506_v5  ;;  %716 = vmatpush.msrb.mxu0 %v2552_v51  ;;  %v887_v5 = vsub.f32 %v825_v19, %v2642_v36 }
 0x119   :  { %627 = vmatpush.msra.mxu1 %v2544_v49  ;;  %799 = vmatpush.msrb.mxu3 %v2535_v43  ;;  %v2667_v49 = vsub.f32 %v835_v23, %v2644_v39 }
 0x11a   :  { %553 = vmatmul.f32.vlgmr.msrb.gmra.mxu2 %v2579_v63  ;;  %719 = vmatpush.msrb.mxu0 %v2567_v57  ;;  %v888_v51 = vand.u32 4294901760, %v887_v5  ;;  %v1060_v57 = vand.u32 4294901760, %v2676_v2 }
 0x11b   :  { %629 = vmatpush.msra.mxu1 %v2547_v50  ;;  %771 = vmatpush.msrb.mxu2 %v680_v1  ;;  %v882_v50 = vand.u32 4294901760, %v881_v37  ;;  %v2686_v1 = vsub.f32 %v837_v42, %v2664_v60  ;;  %v1054_v3 = vand.u32 4294901760, %v2667_v49 }
 0x11c   :  { %801 = vmatpush.msrb.mxu3 %v2539_v46  ;;  %722 = vmatpush.msrb.mxu0 %v2587_v56  ;;  %v889_v56 = vsub.f32 %v887_v5, %v888_v51  ;;  %v1061_v7 = vsub.f32 %v2676_v2, %v1060_v57 }
 0x11d   :  { %631 = vmatpush.msra.mxu1 %v2563_v54  ;;  %775 = vmatpush.msrb.mxu2 %v686_v0  ;;  %v2693_v54 = vsub.f32 %v831_v45, %v2672_v34  ;;  %v883_v0 = vsub.f32 %v881_v37, %v882_v50  ;;  %v2702_v40 = vand.u32 4294901760, %v2686_v1 }
 0x11e   :  { %803 = vmatpush.msrb.mxu3 %v2558_v53  ;;  %609 = vmatmul.f32.vlgmr.msra.gmra.mxu0 %v2555_v52  ;;  %v1062_v58 = vand.u32 4294901760, %v1061_v7 }
 0x11f   :  { %779 = vmatpush.msrb.mxu2 %v692_v10  ;;  %697 = vmatmul.f32.vlgmr.msra.gmra.mxu3 %v2555_v52  ;;  %v1066_v9 = vand.u32 4294901760, %v2693_v54  ;;  %v890_v10 = vand.u32 4294901760, %v889_v56  ;;  %v861_v12 = vsub.f32 %v2686_v1, %v2702_v40 }
 0x120   :  { %525 = vmatmul.f32.vlgmr.msrb.gmra.mxu1 %v2555_v52  ;;  %853 = vmatpush.msra.mxu0 %v2640_v32 }
 0x121   :  { %743 = vmatpush.msrb.mxu1 %v2535_v43  ;;  %945 = vmatpush.msra.mxu3 %v2640_v32  ;;  %v1055_v43 = vsub.f32 %v2667_v49, %v1054_v3  ;;  %v1067_v13 = vsub.f32 %v2693_v54, %v1066_v9  ;;  %v862_v14 = vand.u32 4294901760, %v861_v12 }
 0x122   :  { %661 = vmatmul.f32.vlgmr.msra.gmra.mxu2 %v488_v22  ;;  %855 = vmatpush.msra.mxu0 %v2642_v36 }
 0x123   :  { %745 = vmatpush.msrb.mxu1 %v2539_v46  ;;  %918 = vmatpush.msra.mxu2 %v881_v37  ;;  %v884_v46 = vand.u32 4294901760, %v883_v0  ;;  %v1068_v15 = vand.u32 4294901760, %v1067_v13 }
 0x124   :  { %947 = vmatpush.msra.mxu3 %v2642_v36  ;;  %857 = vmatpush.msra.mxu0 %v2659_v59 }
 0x125   :  { %747 = vmatpush.msrb.mxu1 %v2558_v53  ;;  %921 = vmatpush.msra.mxu2 %v887_v5  ;;  %v1056_v53 = vand.u32 4294901760, %v1055_v43 }
 0x126   :  { %949 = vmatpush.msra.mxu3 %v2659_v59  ;;  %725 = vmatmul.f32.vlgmr.msrb.gmra.mxu0 %v2579_v63  ;;  %v896_v63 = vand.u32 4294901760, %v895_v11 }
 0x127   :  { %924 = vmatpush.msra.mxu2 %v893_v47  ;;  %805 = vmatmul.f32.vlgmr.msrb.gmra.mxu3 %v2555_v52 }
 0x128   :  { %633 = vmatmul.f32.vlgmr.msra.gmra.mxu1 %v2555_v52  ;;  %973 = vmatpush.msrb.mxu0 %v882_v50 }
 0x129   :  { %885 = vmatpush.msra.mxu1 %v884_v46  ;;  %1057 = vmatpush.msrb.mxu3 %v1056_v53 }
 0x12a   :  { %781 = vmatmul.f32.vlgmr.msrb.gmra.mxu2 %v2555_v52  ;;  %977 = vmatpush.msrb.mxu0 %v888_v51  ;;  %v1185_v52 = vld [vmem:[%s3108_s2] sm:$0xff] }
 0x12b   :  { %891 = vmatpush.msra.mxu1 %v890_v10  ;;  %1025 = vmatpush.msrb.mxu2 %v2644_v39 }
 0x12c   :  { %1063 = vmatpush.msrb.mxu3 %v1062_v58  ;;  %981 = vmatpush.msrb.mxu0 %v894_v4 }
 0x12d   :  { %897 = vmatpush.msra.mxu1 %v896_v63  ;;  %1027 = vmatpush.msrb.mxu2 %v2654_v48 }
 0x12e   :  { %1069 = vmatpush.msrb.mxu3 %v1068_v15  ;;  %863 = vmatmul.f32.vlgmr.msra.gmra.mxu0 %v862_v14 }
 0x12f   :  { %1029 = vmatpush.msrb.mxu2 %v2672_v34  ;;  %953 = vmatmul.f32.vlgmr.msra.gmra.mxu3 %v2702_v40 }
 0x130   :  { %751 = vmatmul.f32.vlgmr.msrb.gmra.mxu1 %v2597_v33  ;;  %1090 = vmatpush.msra.mxu0 %v2667_v49  ;;  %v2352_v33 = vmov 0  }
 0x131   :  { %1001 = vmatpush.msrb.mxu1 %v2640_v32  ;;  %1173 = vmatpush.msra.mxu3 %v2644_v39 }
 0x132   :  { %927 = vmatmul.f32.vlgmr.msra.gmra.mxu2 %v2686_v1  ;;  %1093 = vmatpush.msra.mxu0 %v2676_v2 }
 0x133   :  { %1003 = vmatpush.msrb.mxu1 %v2642_v36  ;;  %1145 = vmatpush.msra.mxu2 %v1054_v3 }
 0x134   :  { %1175 = vmatpush.msra.mxu3 %v2654_v48  ;;  %1096 = vmatpush.msra.mxu0 %v2693_v54 }
 0x135   :  { %1005 = vmatpush.msrb.mxu1 %v2659_v59  ;;  %1149 = vmatpush.msra.mxu2 %v1060_v57 }
 0x136   :  { %1177 = vmatpush.msra.mxu3 %v2672_v34  ;;  %983 = vmatmul.f32.vlgmr.msrb.gmra.mxu0 %v2664_v60 }
 0x137   :  { %1153 = vmatpush.msra.mxu2 %v1066_v9  ;;  %1071 = vmatmul.f32.vlgmr.msrb.gmra.mxu3 %v2664_v60 }
 0x138   :  { %899 = vmatmul.f32.vlgmr.msra.gmra.mxu1 %v2664_v60  ;;  %2340 = vset.pattern.permute.xlu1 %v2352_v33 }
 0x139   :  { %1117 = vmatpush.msra.mxu1 %v2644_v39  ;;  %2341 = vset.pattern.permute.xlu0 %v2352_v33 }
 0x13a   :  { %1035 = vmatmul.f32.vlgmr.msrb.gmra.mxu2 %v862_v14  ;;  %1188 = vperm.xlu1 %2340, %v1185_v52  }
 0x13b   :  { %1119 = vmatpush.msra.mxu1 %v2654_v48 }
 0x13d   :  { %1121 = vmatpush.msra.mxu1 %v2672_v34 }
 0x13e   :  { %1099 = vmatmul.f32.vlgmr.msra.gmra.mxu0 %v2686_v1 }
 0x13f   :  { %1179 = vmatmul.f32.vlgmr.msra.gmra.mxu3 %v2664_v60 }
 0x140   :  { %1007 = vmatmul.f32.vlgmr.msrb.gmra.mxu1 %v2664_v60 }
 0x142   :  { %1155 = vmatmul.f32.vlgmr.msra.gmra.mxu2 %v2664_v60 }
 0x148   :  { %1125 = vmatmul.f32.vlgmr.msra.gmra.mxu1 %v2702_v40 }
 0x176   :  { %v143_v8 = vpop.f32.mrf.mxu0 }
 0x17c   :  { %v233_v62 = vpop.f32.mrf.mxu3 }
 0x17f   :  { %v207_v61 = vpop.f32.mrf.mxu2  ;;  %v179_v17 = vpop.f32.mrf.mxu1 }
 0x180   :  { %v263_v18 = vpop.f32.mrf.mxu0  ;;  %v180_v25 = vadd.f32 %v179_v17, %v143_v8 }
 0x182   :  { %v208_v32 = vadd.f32 %v207_v61, %v180_v25 }
 0x184   :  { %v234_v39 = vadd.f32 %v233_v62, %v208_v32 }
 0x186   :  { %v264_v48 = vadd.f32 %v263_v18, %v234_v39 }
 0x187   :  { %v351_v20 = vpop.f32.mrf.mxu3 }
 0x18a   :  { %v315_v21 = vpop.f32.mrf.mxu2 }
 0x18b   :  { %v287_v22 = vpop.f32.mrf.mxu1  ;;  %v379_v26 = vpop.f32.mrf.mxu0  ;;  %v352_v59 = vadd.f32 %v351_v20, %v315_v21 }
 0x18c   :  { %v288_v5 = vadd.f32 %v287_v22, %v264_v48 }
 0x18d   :  { %v380_v60 = vadd.f32 %v379_v26, %v352_v59 }
 0x192   :  { %v459_v23 = vpop.f32.mrf.mxu3 }
 0x193   :  { %v490_v24 = vpop.f32.mrf.mxu0 }
 0x194   :  { %v435_v55 = vpop.f32.mrf.mxu2  ;;  %v491_v49 = vadd.f32 %v490_v24, %v288_v5 }
 0x195   :  { %v405_v19 = vpop.f32.mrf.mxu1 }
 0x196   :  { %v406_v47 = vadd.f32 %v405_v19, %v380_v60 }
 0x198   :  { %v436_v3 = vadd.f32 %v435_v55, %v406_v47 }
 0x19a   :  { %v580_v29 = vpop.f32.mrf.mxu3  ;;  %v460_v56 = vadd.f32 %v459_v23, %v436_v3 }
 0x19b   :  { %v610_v30 = vpop.f32.mrf.mxu0 }
 0x19d   :  { %v526_v31 = vpop.f32.mrf.mxu1  ;;  %v554_v36 = vpop.f32.mrf.mxu2 }
 0x19e   :  { %v527_v51 = vadd.f32 %v526_v31, %v491_v49 }
 0x1a0   :  { %v555_v54 = vadd.f32 %v554_v36, %v527_v51 }
 0x1a2   :  { %v698_v41 = vpop.f32.mrf.mxu3  ;;  %v581_v4 = vadd.f32 %v580_v29, %v555_v54 }
 0x1a3   :  { %v726_v42 = vpop.f32.mrf.mxu0 }
 0x1a4   :  { %v611_v10 = vadd.f32 %v610_v30, %v581_v4 }
 0x1a5   :  { %v634_v45 = vpop.f32.mrf.mxu1  ;;  %v662_v37 = vpop.f32.mrf.mxu2 }
 0x1a6   :  { %v663_v9 = vadd.f32 %v662_v37, %v460_v56  ;;  %v635_v63 = vadd.f32 %v634_v45, %v611_v10 }
 0x1a8   :  { %v699_v12 = vadd.f32 %v698_v41, %v663_v9 }
 0x1aa   :  { %v806_v34 = vpop.f32.mrf.mxu3  ;;  %v727_v33 = vadd.f32 %v726_v42, %v699_v12 }
 0x1ab   :  { %v864_v50 = vpop.f32.mrf.mxu0 }
 0x1ac   :  { %v1189_v52 = vpop.permute.xlu1 %1188 }
 0x1ad   :  { %v752_v2 = vpop.f32.mrf.mxu1  ;;  %v782_v1 = vpop.f32.mrf.mxu2 }
 0x1ae   :  { %v753_v17 = vadd.f32 %v752_v2, %v727_v33 }
 0x1b0   :  { %v783_v26 = vadd.f32 %v782_v1, %v753_v17 }
 0x1b2   :  { %v954_v57 = vpop.f32.mrf.mxu3  ;;  %v807_v25 = vadd.f32 %v806_v34, %v783_v26 }
 0x1b3   :  { %v984_v7 = vpop.f32.mrf.mxu0 }
 0x1b5   :  { %v900_v0 = vpop.f32.mrf.mxu1  ;;  %v928_v43 = vpop.f32.mrf.mxu2 }
 0x1b6   :  { %v901_v40 = vadd.f32 %v900_v0, %v864_v50 }
 0x1b8   :  { %v929_v46 = vadd.f32 %v928_v43, %v901_v40 }
 0x1ba   :  { %v955_v11 = vadd.f32 %v954_v57, %v929_v46  ;;  %v1072_v13 = vpop.f32.mrf.mxu3 }
 0x1bb   :  { %v1100_v61 = vpop.f32.mrf.mxu0 }
 0x1bc   :  { %v985_v53 = vadd.f32 %v984_v7, %v955_v11 }
 0x1bd   :  { %v1008_v58 = vpop.f32.mrf.mxu1  ;;  %v1036_v15 = vpop.f32.mrf.mxu2 }
 0x1be   :  { %v1009_v14 = vadd.f32 %v1008_v58, %v985_v53  ;;  %v1073_v62 = vadd.f32 %v1072_v13, %v1036_v15 }
 0x1c0   :  { %v1183_v8 = vadd.f32 %v1009_v14, %v635_v63  ;;  %v1101_v21 = vadd.f32 %v1100_v61, %v1073_v62 }
 0x1c2   :  { %v1191_v18 = vadd.f32 %v1189_v52, %v1183_v8  ;;  %v1180_v19 = vpop.f32.mrf.mxu3 }
 0x1c4   :  { %v2748_v20 = vmax.f32 %v1191_v18, 0.0 }
 0x1c5   :  { %v1126_v22 = vpop.f32.mrf.mxu1  ;;  %v1156_v24 = vpop.f32.mrf.mxu2 }
 0x1c6   :  { %v1127_v23 = vadd.f32 %v1126_v22, %v1101_v21  ;;  %1195 = vrot.lane.b32.xlu1 %v2748_v20, %s2346_s20  ;;  %1203 = vrot.lane.b32.xlu2 %v2748_v20, %s2347_s21 }
 0x1c8   :  { %v1157_v55 = vadd.f32 %v1156_v24, %v1127_v23 }
 0x1ca   :  { %v1181_v29 = vadd.f32 %v1180_v19, %v1157_v55 }
 0x1cc   :  { %v1184_v30 = vadd.f32 %v1181_v29, %v807_v25 }
 0x1ce   :  { %v1192_v31 = vadd.f32 %v1189_v52, %v1184_v30 }
 0x1d0   :  { %v2754_v32 = vmax.f32 %v1192_v31, 0.0 }
 0x1d2   :  { %1205 = vrot.lane.b32.xlu0 %v2754_v32, %s2347_s21  ;;  %1197 = vrot.lane.b32.xlu2 %v2754_v32, %s2346_s20 }
 0x1da   :  { %1216 = vrot.lane.b32.xlu2 %v2748_v20, %s2348_s24 }
 0x220   :  { %v1204_v36 = vpop.permute.xlu2 %1203 }
 0x22c   :  { %v1198_v39 = vpop.permute.xlu2 %1197 }
 0x234   :  { %v1217_v34 = vpop.permute.xlu2 %1216 }
 0x238   :  { %v1196_v41 = vpop.permute.xlu1 %1195 }
 0x239   :  { %v1199_v42 = vsel %vm72_vm3, %v1196_v41, %v1198_v39 }
 0x23a   :  { %v2765_v45 = vmul.f32 %v2415_v27, %v1199_v42  ;;  %v1200_v27 = vsel %vm72_vm3, %v1198_v39, %v1196_v41  ;;  %v2331_v42 = vld [vmem:[%s3109_s3 + $0x8] sm:$0xff] }
 0x23b   :  { %v2790_v49 = vmul.f32 %v2451_v38, %v1200_v27  ;;  %v1586_v27 = vsel %vm114_vm9, %v2331_v42, 0 }
 0x23c   :  { %1220 = vrot.lane.b32.xlu2 %v2765_v45, %s2348_s24 }
 0x244   :  { %v1206_v48 = vpop.permute.xlu0 %1205  ;;  %1936 = vrot.lane.b32.xlu2 %v2748_v20, %s2351_s25 }
 0x245   :  { %v1207_v37 = vsel %vm81_vm4, %v1204_v36, %v1206_v48  ;;  %v1208_v59 = vsel %vm81_vm4, %v1206_v48, %v1204_v36 }
 0x246   :  { %v2776_v5 = vmul.f32 %v2418_v28, %v1207_v37  ;;  %v2779_v60 = vmul.f32 %v2437_v35, %v1208_v59  ;;  %v1213_v28 = vld [vmem:[%s3109_s3] sm:$0xff] }
 0x247   :  { %v1239_v35 = vsel %vm114_vm9, %v1213_v28, 0  ;;  %v2892_v28 = vand.u32 4294901760, %v2748_v20 }
 0x248   :  { %1224 = vrot.lane.b32.xlu1 %v2779_v60, %s2348_s24  ;;  %1218 = vrot.lane.b32.xlu0 %v2776_v5, %s2348_s24  ;;  %v2808_v38 = vand.u32 4294901760, %v1239_v35  ;;  %v2880_v48 = vand.u32 4294901760, %v2779_v60  ;;  %v2886_v59 = vand.u32 4294901760, %v2776_v5 }
 0x24a   :  { %v2811_v47 = vsub.f32 %v1239_v35, %v2808_v38  ;;  %v2895_v35 = vand.u32 4294901760, %v2754_v32 }
 0x24c   :  { %1940 = vrot.lane.b32.xlu2 %v2765_v45, %s2351_s25  ;;  %v2826_v56 = vand.u32 4294901760, %v2811_v47 }
 0x24e   :  { %v1263_v10 = vsub.f32 %v2811_v47, %v2826_v56 }
 0x250   :  { %1222 = vrot.lane.b32.xlu0 %v2754_v32, %s2348_s24  ;;  %1214 = vrot.lane.b32.xlu1 %v2790_v49, %s2348_s24  ;;  %v1264_v21 = vand.u32 4294901760, %v1263_v10 }
 0x258   :  { %1938 = vrot.lane.b32.xlu0 %v2776_v5, %s2351_s25  ;;  %1944 = vrot.lane.b32.xlu1 %v2779_v60, %s2351_s25 }
 0x260   :  { %1942 = vrot.lane.b32.xlu0 %v2754_v32, %s2351_s25  ;;  %1934 = vrot.lane.b32.xlu1 %v2790_v49, %s2351_s25 }
 0x296   :  { %v1221_v40 = vpop.permute.xlu2 %1220 }
 0x2ba   :  { %v1225_v2 = vpop.permute.xlu1 %1224  ;;  %v1219_v50 = vpop.permute.xlu0 %1218 }
 0x2bb   :  { %v1228_v51 = vsel %vm101_vm8, %v1219_v50, %v1225_v2  ;;  %v1231_v1 = vsel %vm101_vm8, %v1225_v2, %v1219_v50  ;;  %v2902_v2 = vsub.f32 %v2779_v60, %v2880_v48  ;;  %v2908_v50 = vand.u32 4294901760, %v2790_v49 }
 0x2bc   :  { %v1236_v3 = vmul.f32 %v2471_v44, %v1231_v1  ;;  %v2818_v54 = vand.u32 4294901760, %v1228_v51  ;;  %v2914_v1 = vand.u32 4294901760, %v1586_v27  ;;  %v1636_v60 = vsub.f32 %v2748_v20, %v2892_v28 }
 0x2be   :  { %v2820_v57 = vand.u32 4294901760, %v1236_v3  ;;  %v2823_v0 = vsub.f32 %v1228_v51, %v2818_v54  ;;  %v1630_v51 = vsub.f32 %v2776_v5, %v2886_v59  ;;  %v1642_v5 = vsub.f32 %v2790_v49, %v2908_v50 }
 0x2c0   :  { %v1283_v4 = vsub.f32 %v1236_v3, %v2820_v57  ;;  %1255 = vmatpush.msrb.mxu0 %v2820_v57  ;;  %1347 = vmatpush.msrb.mxu3 %v2820_v57  ;;  %v1456_v7 = vand.u32 4294901760, %v2823_v0  ;;  %v2923_v3 = vsub.f32 %v2754_v32, %v2895_v35  ;;  %v1631_v20 = vand.u32 4294901760, %v1630_v51 }
 0x2c1   :  { %v2936_v32 = vsub.f32 %v1586_v27, %v2914_v1 }
 0x2c2   :  { %v1284_v43 = vand.u32 4294901760, %v1283_v4  ;;  %1320 = vmatpush.msrb.mxu2 %v1283_v4  ;;  %v1223_v9 = vpop.permute.xlu0 %1222  ;;  %v1215_v46 = vpop.permute.xlu1 %1214  ;;  %v1457_v17 = vsub.f32 %v2823_v0, %v1456_v7  ;;  %v1809_v49 = vand.u32 4294901760, %v2923_v3  ;;  %v1632_v10 = vsub.f32 %v1630_v51, %v1631_v20 }
 0x2c3   :  { %v1227_v11 = vsel %vm101_vm8, %v1217_v34, %v1223_v9  ;;  %v1230_v12 = vsel %vm101_vm8, %v1223_v9, %v1217_v34  ;;  %v1226_v53 = vsel %vm101_vm8, %v1215_v46, %v1221_v40  ;;  %v1229_v58 = vsel %vm101_vm8, %v1221_v40, %v1215_v46 }
 0x2c4   :  { %v1234_v13 = vmul.f32 %v2471_v44, %v1230_v12  ;;  %v2843_v63 = vand.u32 4294901760, %v1227_v11  ;;  %v1232_v14 = vmul.f32 %v2471_v44, %v1229_v58  ;;  %v2846_v15 = vand.u32 4294901760, %v1226_v53 }
 0x2c5   :  { %v1285_v52 = vsub.f32 %v1283_v4, %v1284_v43  ;;  %v1458_v25 = vand.u32 4294901760, %v1457_v17  ;;  %v2898_v34 = vand.u32 4294901760, %v2765_v45  ;;  %v1643_v9 = vand.u32 4294901760, %v1642_v5 }
 0x2c6   :  { %v2848_v33 = vand.u32 4294901760, %v1234_v13  ;;  %v2851_v8 = vsub.f32 %v1227_v11, %v2843_v63  ;;  %v2853_v62 = vand.u32 4294901760, %v1232_v14  ;;  %v2856_v61 = vsub.f32 %v1226_v53, %v2846_v15 }
 0x2c7   :  { %v1286_v18 = vand.u32 4294901760, %v1285_v52  ;;  %v2931_v4 = vsub.f32 %v2765_v45, %v2898_v34  ;;  %v1637_v45 = vand.u32 4294901760, %v1636_v60  ;;  %v2952_v11 = vand.u32 4294901760, %v2936_v32 }
 0x2c8   :  { %1257 = vmatpush.msrb.mxu0 %v2848_v33  ;;  %1349 = vmatpush.msrb.mxu3 %v2848_v33  ;;  %v1289_v44 = vsub.f32 %v1234_v13, %v2848_v33  ;;  %v1295_v22 = vsub.f32 %v1232_v14, %v2853_v62  ;;  %v1462_v26 = vand.u32 4294901760, %v2851_v8  ;;  %v1468_v23 = vand.u32 4294901760, %v2856_v61 }
 0x2c9   :  { %1287 = vmatpush.msrb.mxu1 %v1286_v18  ;;  %v1815_v46 = vand.u32 4294901760, %v2931_v4  ;;  %v1638_v12 = vsub.f32 %v1636_v60, %v1637_v45  ;;  %v1644_v13 = vsub.f32 %v1642_v5, %v1643_v9  ;;  %v1610_v14 = vsub.f32 %v2936_v32, %v2952_v11 }
 0x2ca   :  { %1259 = vmatpush.msrb.mxu0 %v2853_v62  ;;  %1323 = vmatpush.msrb.mxu2 %v1289_v44  ;;  %v1290_v24 = vand.u32 4294901760, %v1289_v44  ;;  %v1463_v19 = vsub.f32 %v2851_v8, %v1462_v26  ;;  %v1296_v55 = vand.u32 4294901760, %v1295_v22  ;;  %v1469_v29 = vsub.f32 %v2856_v61, %v1468_v23  ;;  %v1945_v40 = vpop.permute.xlu1 %1944 }
 0x2cb   :  { %1351 = vmatpush.msrb.mxu3 %v2853_v62  ;;  %1265 = vmatmul.f32.vlgmr.msrb.gmra.mxu0 %v1264_v21  ;;  %v1816_v58 = vsub.f32 %v2931_v4, %v1815_v46  ;;  %v1645_v17 = vand.u32 4294901760, %v1644_v13 }
 0x2cc   :  { %1355 = vmatmul.f32.vlgmr.msrb.gmra.mxu3 %v2826_v56  ;;  %1375 = vmatpush.msra.mxu0 %v1284_v43  ;;  %v1464_v30 = vand.u32 4294901760, %v1463_v19  ;;  %v1291_v31 = vsub.f32 %v1289_v44, %v1290_v24  ;;  %v1297_v39 = vsub.f32 %v1295_v22, %v1296_v55  ;;  %v1470_v41 = vand.u32 4294901760, %v1469_v29  ;;  %v1937_v43 = vpop.permute.xlu2 %1936 }
 0x2cd   :  { %1459 = vmatpush.msra.mxu3 %v1458_v25  ;;  %1326 = vmatpush.msrb.mxu2 %v1295_v22 }
 0x2ce   :  { %1329 = vmatmul.f32.vlgmr.msrb.gmra.mxu2 %v2811_v47  ;;  %1379 = vmatpush.msra.mxu0 %v1290_v24  ;;  %v1292_v36 = vand.u32 4294901760, %v1291_v31  ;;  %v1298_v37 = vand.u32 4294901760, %v1297_v39 }
 0x2cf   :  { %1427 = vmatpush.msra.mxu2 %v2818_v54  ;;  %1465 = vmatpush.msra.mxu3 %v1464_v30 }
 0x2d0   :  { %1383 = vmatpush.msra.mxu0 %v1296_v55  ;;  %1293 = vmatpush.msrb.mxu1 %v1292_v36 }
 0x2d1   :  { %1429 = vmatpush.msra.mxu2 %v2843_v63  ;;  %1471 = vmatpush.msra.mxu3 %v1470_v41 }
 0x2d2   :  { %1492 = vmatpush.msrb.mxu0 %v2823_v0  ;;  %1299 = vmatpush.msrb.mxu1 %v1298_v37  ;;  %v1803_v0 = vand.u32 4294901760, %v2902_v2 }
 0x2d3   :  { %1575 = vmatpush.msrb.mxu3 %v2818_v54  ;;  %1431 = vmatpush.msra.mxu2 %v2846_v15 }
 0x2d4   :  { %1495 = vmatpush.msrb.mxu0 %v2851_v8  ;;  %1301 = vmatmul.f32.vlgmr.msrb.gmra.mxu1 %v2808_v38  ;;  %v1639_v8 = vand.u32 4294901760, %v1638_v12 }
 0x2d5   :  { %1547 = vmatpush.msrb.mxu2 %v1456_v7  ;;  %1385 = vmatmul.f32.vlgmr.msra.gmra.mxu0 %v2808_v38  ;;  %v1804_v7 = vsub.f32 %v2902_v2, %v1803_v0 }
 0x2d6   :  { %1403 = vmatpush.msra.mxu1 %v2820_v57  ;;  %1473 = vmatmul.f32.vlgmr.msra.gmra.mxu3 %v2808_v38  ;;  %v1939_v57 = vpop.permute.xlu0 %1938 }
 0x2d7   :  { %1498 = vmatpush.msrb.mxu0 %v2856_v61  ;;  %1577 = vmatpush.msrb.mxu3 %v2843_v63  ;;  %v1805_v53 = vand.u32 4294901760, %v1804_v7  ;;  %v1951_v52 = vsel %vm823_vm11, %v1945_v40, %v1939_v57  ;;  %v1817_v61 = vand.u32 4294901760, %v1816_v58  ;;  %v1948_v18 = vsel %vm823_vm11, %v1939_v57, %v1945_v40 }
 0x2d8   :  { %1551 = vmatpush.msrb.mxu2 %v1462_v26  ;;  %1405 = vmatpush.msra.mxu1 %v2848_v33  ;;  %v2985_v24 = vand.u32 4294901760, %v1948_v18 }
 0x2d9   :  { %1437 = vmatmul.f32.vlgmr.msra.gmra.mxu2 %v1264_v21  ;;  %1579 = vmatpush.msrb.mxu3 %v2846_v15  ;;  %v1957_v21 = vmul.f32 %v2619_v16, %v1951_v52 }
 0x2da   :  { %1602 = vmatpush.msra.mxu0 %v2886_v59  ;;  %1555 = vmatpush.msrb.mxu2 %v1468_v23  ;;  %v2332_v23 = vld [vmem:[%s3109_s3 + $0x10] sm:$0xff]  ;;  %v2003_v6 = vsub.f32 %v1948_v18, %v2985_v24 }
 0x2db   :  { %1694 = vmatpush.msra.mxu3 %v2886_v59  ;;  %1407 = vmatpush.msra.mxu1 %v2853_v62  ;;  %v1935_v62 = vpop.permute.xlu1 %1934  ;;  %v2990_v55 = vand.u32 4294901760, %v1957_v21  ;;  %v1959_v31 = vsel %vm114_vm9, %v2332_v23, 0 }
 0x2dc   :  { %1604 = vmatpush.msra.mxu0 %v2892_v28  ;;  %1667 = vmatpush.msra.mxu2 %v1630_v51  ;;  %v3016_v39 = vand.u32 4294901760, %v1959_v31  ;;  %v2004_v37 = vand.u32 4294901760, %v2003_v6 }
 0x2dd   :  { %1519 = vmatpush.msrb.mxu1 %v2818_v54  ;;  %1696 = vmatpush.msra.mxu3 %v2892_v28  ;;  %v1810_v54 = vsub.f32 %v2923_v3, %v1809_v49 }
 0x2de   :  { %1606 = vmatpush.msra.mxu0 %v2908_v50  ;;  %1670 = vmatpush.msra.mxu2 %v1636_v60  ;;  %v1943_v33 = vpop.permute.xlu0 %1942  ;;  %v2005_v60 = vsub.f32 %v2003_v6, %v2004_v37 }
 0x2df   :  { %1521 = vmatpush.msrb.mxu1 %v2843_v63  ;;  %1698 = vmatpush.msra.mxu3 %v2908_v50  ;;  %v1633_v63 = vand.u32 4294901760, %v1632_v10  ;;  %v1950_v44 = vsel %vm823_vm11, %v1943_v33, %v1937_v43  ;;  %v1947_v22 = vsel %vm823_vm11, %v1937_v43, %v1943_v33 }
 0x2e0   :  { %1409 = vmatmul.f32.vlgmr.msra.gmra.mxu1 %v2808_v38  ;;  %1501 = vmatmul.f32.vlgmr.msrb.gmra.mxu0 %v2811_v47  ;;  %v1811_v47 = vand.u32 4294901760, %v1810_v54  ;;  %v1955_v19 = vmul.f32 %v2619_v16, %v1950_v44  ;;  %v2995_v29 = vand.u32 4294901760, %v1947_v22 }
 0x2e1   :  { %1581 = vmatmul.f32.vlgmr.msrb.gmra.mxu3 %v2808_v38  ;;  %1673 = vmatpush.msra.mxu2 %v1642_v5 }
 0x2e2   :  { %1722 = vmatpush.msrb.mxu0 %v1631_v20  ;;  %1806 = vmatpush.msrb.mxu3 %v1805_v53  ;;  %v2009_v41 = vsub.f32 %v1947_v22, %v2995_v29 }
 0x2e3   :  { %1523 = vmatpush.msrb.mxu1 %v2846_v15  ;;  %1557 = vmatmul.f32.vlgmr.msrb.gmra.mxu2 %v2808_v38  ;;  %v1611_v38 = vand.u32 4294901760, %v1610_v14  ;;  %v1941_v15 = vpop.permute.xlu2 %1940 }
 0x2e4   :  { %1726 = vmatpush.msrb.mxu0 %v1637_v45  ;;  %1774 = vmatpush.msrb.mxu2 %v2880_v48  ;;  %v1949_v26 = vsel %vm823_vm11, %v1941_v15, %v1935_v62  ;;  %v1946_v25 = vsel %vm823_vm11, %v1935_v62, %v1941_v15  ;;  %v2010_v51 = vand.u32 4294901760, %v2009_v41 }
 0x2e5   :  { %1634 = vmatpush.msra.mxu1 %v1633_v63  ;;  %1812 = vmatpush.msrb.mxu3 %v1811_v47  ;;  %v1953_v30 = vmul.f32 %v2619_v16, %v1949_v26  ;;  %v3006_v36 = vand.u32 4294901760, %v1946_v25  ;;  %v3011_v16 = vsub.f32 %v1957_v21, %v2990_v55 }
 0x2e6   :  { %1730 = vmatpush.msrb.mxu0 %v1643_v9  ;;  %1776 = vmatpush.msrb.mxu2 %v2895_v35 }
 0x2e7   :  { %1640 = vmatpush.msra.mxu1 %v1639_v8  ;;  %1818 = vmatpush.msrb.mxu3 %v1817_v61  ;;  %v3019_v42 = vand.u32 4294901760, %v1953_v30  ;;  %v2015_v27 = vsub.f32 %v1946_v25, %v3006_v36 }
 0x2e8   :  { %1778 = vmatpush.msrb.mxu2 %v2898_v34  ;;  %1527 = vmatmul.f32.vlgmr.msrb.gmra.mxu1 %v2826_v56  ;;  %v3004_v56 = vand.u32 4294901760, %v1955_v19 }
 0x2e9   :  { %1646 = vmatpush.msra.mxu1 %v1645_v17  ;;  %1612 = vmatmul.f32.vlgmr.msra.gmra.mxu0 %v1611_v38  ;;  %v2016_v57 = vand.u32 4294901760, %v2015_v27 }
 0x2ea   :  { %1702 = vmatmul.f32.vlgmr.msra.gmra.mxu3 %v2952_v11  ;;  %1839 = vmatpush.msra.mxu0 %v2902_v2  ;;  %v3036_v2 = vsub.f32 %v1959_v31, %v3016_v39 }
 0x2eb   :  { %1750 = vmatpush.msrb.mxu1 %v2886_v59  ;;  %1922 = vmatpush.msra.mxu3 %v2880_v48  ;;  %v3027_v59 = vsub.f32 %v1955_v19, %v3004_v56  ;;  %v2017_v40 = vsub.f32 %v2015_v27, %v2016_v57 }
 0x2ec   :  { %1676 = vmatmul.f32.vlgmr.msra.gmra.mxu2 %v2936_v32  ;;  %1842 = vmatpush.msra.mxu0 %v2923_v3 }
 0x2ed   :  { %1752 = vmatpush.msrb.mxu1 %v2892_v28  ;;  %1894 = vmatpush.msra.mxu2 %v1803_v0  ;;  %v2176_v28 = vand.u32 4294901760, %v3011_v16  ;;  %v2182_v3 = vand.u32 4294901760, %v3027_v59  ;;  %v3050_v0 = vand.u32 4294901760, %v3036_v2  ;;  %v2018_v9 = vand.u32 4294901760, %v2017_v40 }
 0x2ee   :  { %1924 = vmatpush.msra.mxu3 %v2895_v35  ;;  %1845 = vmatpush.msra.mxu0 %v2931_v4 }
 0x2ef   :  { %1754 = vmatpush.msrb.mxu1 %v2908_v50  ;;  %1898 = vmatpush.msra.mxu2 %v1809_v49  ;;  %v3039_v50 = vsub.f32 %v1953_v30, %v3019_v42  ;;  %v2177_v5 = vsub.f32 %v3011_v16, %v2176_v28  ;;  %v2183_v20 = vsub.f32 %v3027_v59, %v2182_v3 }
 0x2f0   :  { %1926 = vmatpush.msra.mxu3 %v2898_v34  ;;  %1648 = vmatmul.f32.vlgmr.msra.gmra.mxu1 %v2914_v1 }
 0x2f1   :  { %1902 = vmatpush.msra.mxu2 %v1815_v46  ;;  %1732 = vmatmul.f32.vlgmr.msrb.gmra.mxu0 %v2914_v1  ;;  %v2188_v4 = vand.u32 4294901760, %v3039_v50  ;;  %v2178_v45 = vand.u32 4294901760, %v2177_v5  ;;  %v2184_v7 = vand.u32 4294901760, %v2183_v20 }
 0x2f2   :  { %1820 = vmatmul.f32.vlgmr.msrb.gmra.mxu3 %v2914_v1  ;;  %1866 = vmatpush.msra.mxu1 %v2880_v48  ;;  %v2011_v48 = vsub.f32 %v2009_v41, %v2010_v51 }
 0x2f3   :  { %1975 = vmatpush.msrb.mxu0 %v2985_v24  ;;  %2067 = vmatpush.msrb.mxu3 %v2985_v24  ;;  %v2189_v43 = vsub.f32 %v3039_v50, %v2188_v4 }
 0x2f4   :  { %1784 = vmatmul.f32.vlgmr.msrb.gmra.mxu2 %v1611_v38  ;;  %1868 = vmatpush.msra.mxu1 %v2895_v35  ;;  %v2006_v35 = vand.u32 4294901760, %v2005_v60  ;;  %v2012_v49 = vand.u32 4294901760, %v2011_v48 }
 0x2f5   :  { %1977 = vmatpush.msrb.mxu0 %v2995_v29  ;;  %2040 = vmatpush.msrb.mxu2 %v2003_v6  ;;  %v2190_v46 = vand.u32 4294901760, %v2189_v43 }
 0x2f6   :  { %2069 = vmatpush.msrb.mxu3 %v2995_v29  ;;  %1870 = vmatpush.msra.mxu1 %v2898_v34  ;;  %v1983_v34 = vsub.f32 %v3036_v2, %v3050_v0 }
 0x2f7   :  { %1979 = vmatpush.msrb.mxu0 %v3006_v36  ;;  %2043 = vmatpush.msrb.mxu2 %v2009_v41 }
 0x2f8   :  { %2071 = vmatpush.msrb.mxu3 %v3006_v36  ;;  %1756 = vmatmul.f32.vlgmr.msrb.gmra.mxu1 %v2914_v1 }
 0x2f9   :  { %2046 = vmatpush.msrb.mxu2 %v2015_v27  ;;  %1848 = vmatmul.f32.vlgmr.msra.gmra.mxu0 %v2936_v32  ;;  %v1984_v32 = vand.u32 4294901760, %v1983_v34 }
 0x2fa   :  { %1928 = vmatmul.f32.vlgmr.msra.gmra.mxu3 %v2914_v1  ;;  %2007 = vmatpush.msrb.mxu1 %v2006_v35 }
 0x2fb   :  { %2095 = vmatpush.msra.mxu0 %v2004_v37  ;;  %2179 = vmatpush.msra.mxu3 %v2178_v45 }
 0x2fc   :  { %1904 = vmatmul.f32.vlgmr.msra.gmra.mxu2 %v2914_v1  ;;  %2013 = vmatpush.msrb.mxu1 %v2012_v49  ;;  %v2309_v1 = vld [vmem:[%s3110_s4] sm:$0xff] }
 0x2fd   :  { %2099 = vmatpush.msra.mxu0 %v2010_v51  ;;  %2147 = vmatpush.msra.mxu2 %v2990_v55 }
 0x2fe   :  { %2185 = vmatpush.msra.mxu3 %v2184_v7  ;;  %2019 = vmatpush.msrb.mxu1 %v2018_v9 }
 0x2ff   :  { %2103 = vmatpush.msra.mxu0 %v2016_v57  ;;  %2149 = vmatpush.msra.mxu2 %v3004_v56 }
 0x300   :  { %2191 = vmatpush.msra.mxu3 %v2190_v46  ;;  %1874 = vmatmul.f32.vlgmr.msra.gmra.mxu1 %v2952_v11 }
 0x301   :  { %2151 = vmatpush.msra.mxu2 %v3019_v42  ;;  %1985 = vmatmul.f32.vlgmr.msrb.gmra.mxu0 %v1984_v32 }
 0x302   :  { %2075 = vmatmul.f32.vlgmr.msrb.gmra.mxu3 %v3050_v0  ;;  %2123 = vmatpush.msra.mxu1 %v2985_v24 }
 0x303   :  { %2212 = vmatpush.msrb.mxu0 %v3011_v16  ;;  %2295 = vmatpush.msrb.mxu3 %v2990_v55 }
 0x304   :  { %2049 = vmatmul.f32.vlgmr.msrb.gmra.mxu2 %v3036_v2  ;;  %2125 = vmatpush.msra.mxu1 %v2995_v29 }
 0x305   :  { %2215 = vmatpush.msrb.mxu0 %v3027_v59  ;;  %2267 = vmatpush.msrb.mxu2 %v2176_v28 }
 0x306   :  { %2297 = vmatpush.msrb.mxu3 %v3004_v56  ;;  %2127 = vmatpush.msra.mxu1 %v3006_v36 }
 0x307   :  { %2218 = vmatpush.msrb.mxu0 %v3039_v50  ;;  %2271 = vmatpush.msrb.mxu2 %v2182_v3 }
 0x308   :  { %2299 = vmatpush.msrb.mxu3 %v3019_v42  ;;  %2021 = vmatmul.f32.vlgmr.msrb.gmra.mxu1 %v3016_v39 }
 0x309   :  { %2275 = vmatpush.msrb.mxu2 %v2188_v4  ;;  %2239 = vmatpush.msrb.mxu1 %v2990_v55 }
 0x30a   :  { %2105 = vmatmul.f32.vlgmr.msra.gmra.mxu0 %v3016_v39  ;;  %2193 = vmatmul.f32.vlgmr.msra.gmra.mxu3 %v3016_v39 }
 0x30b   :  { %2241 = vmatpush.msrb.mxu1 %v3004_v56  ;;  %2312 = vperm.xlu0 %2341, %v2309_v1  }
 0x30c   :  { %2157 = vmatmul.f32.vlgmr.msra.gmra.mxu2 %v1984_v32  ;;  %v2344_v32 = vld [vmem:[%s3106_s0] sm:$0xff] }
 0x30d   :  { %2243 = vmatpush.msrb.mxu1 %v3019_v42 }
 0x310   :  { %2129 = vmatmul.f32.vlgmr.msra.gmra.mxu1 %v3016_v39 }
 0x312   :  { %2221 = vmatmul.f32.vlgmr.msrb.gmra.mxu0 %v3036_v2  ;;  %2301 = vmatmul.f32.vlgmr.msrb.gmra.mxu3 %v3016_v39 }
 0x314   :  { %2277 = vmatmul.f32.vlgmr.msrb.gmra.mxu2 %v3016_v39 }
 0x318   :  { %2247 = vmatmul.f32.vlgmr.msrb.gmra.mxu1 %v3050_v0 }
 0x348   :  { %v1266_v10 = vpop.f32.mrf.mxu0 }
 0x34f   :  { %v1356_v11 = vpop.f32.mrf.mxu3 }
 0x351   :  { %v1302_v54 = vpop.f32.mrf.mxu1  ;;  %v1330_v12 = vpop.f32.mrf.mxu2 }
 0x352   :  { %v1386_v53 = vpop.f32.mrf.mxu0  ;;  %v1303_v62 = vadd.f32 %v1302_v54, %v1266_v10 }
 0x354   :  { %v1331_v18 = vadd.f32 %v1330_v12, %v1303_v62 }
 0x356   :  { %v1357_v38 = vadd.f32 %v1356_v11, %v1331_v18 }
 0x358   :  { %v1387_v26 = vadd.f32 %v1386_v53, %v1357_v38 }
 0x359   :  { %v1474_v58 = vpop.f32.mrf.mxu3 }
 0x35c   :  { %v1438_v63 = vpop.f32.mrf.mxu2 }
 0x35d   :  { %v1410_v13 = vpop.f32.mrf.mxu1  ;;  %v1502_v14 = vpop.f32.mrf.mxu0  ;;  %v1475_v19 = vadd.f32 %v1474_v58, %v1438_v63 }
 0x35e   :  { %v1411_v55 = vadd.f32 %v1410_v13, %v1387_v26 }
 0x35f   :  { %v1503_v25 = vadd.f32 %v1502_v14, %v1475_v19 }
 0x364   :  { %v1582_v52 = vpop.f32.mrf.mxu3 }
 0x365   :  { %v1528_v33 = vpop.f32.mrf.mxu1 }
 0x366   :  { %v1558_v47 = vpop.f32.mrf.mxu2  ;;  %v1613_v8 = vpop.f32.mrf.mxu0  ;;  %v1529_v6 = vadd.f32 %v1528_v33, %v1503_v25  ;;  %v2345_v33 = vld [vmem:[%s3106_s0 + $0x8] sm:$0xff] }
 0x367   :  { %v1614_v29 = vadd.f32 %v1613_v8, %v1411_v55 }
 0x368   :  { %v1559_v39 = vadd.f32 %v1558_v47, %v1529_v6 }
 0x36a   :  { %v1583_v59 = vadd.f32 %v1582_v52, %v1559_v39 }
 0x36d   :  { %v1703_v61 = vpop.f32.mrf.mxu3  ;;  %v1649_v17 = vpop.f32.mrf.mxu1 }
 0x36e   :  { %v1733_v44 = vpop.f32.mrf.mxu0  ;;  %v1650_v56 = vadd.f32 %v1649_v17, %v1614_v29 }
 0x36f   :  { %v1677_v21 = vpop.f32.mrf.mxu2 }
 0x370   :  { %v1678_v41 = vadd.f32 %v1677_v21, %v1650_v56 }
 0x372   :  { %v1704_v27 = vadd.f32 %v1703_v61, %v1678_v41 }
 0x374   :  { %v1734_v3 = vadd.f32 %v1733_v44, %v1704_v27 }
 0x375   :  { %v1757_v15 = vpop.f32.mrf.mxu1  ;;  %v1821_v22 = vpop.f32.mrf.mxu3 }
 0x376   :  { %v1849_v23 = vpop.f32.mrf.mxu0  ;;  %v1758_v35 = vadd.f32 %v1757_v15, %v1734_v3 }
 0x377   :  { %v1785_v24 = vpop.f32.mrf.mxu2 }
 0x378   :  { %v1786_v51 = vadd.f32 %v1785_v24, %v1583_v59 }
 0x37a   :  { %v1822_v5 = vadd.f32 %v1821_v22, %v1786_v51 }
 0x37c   :  { %v1850_v45 = vadd.f32 %v1849_v23, %v1822_v5 }
 0x37d   :  { %v1875_v30 = vpop.f32.mrf.mxu1  ;;  %v1929_v31 = vpop.f32.mrf.mxu3 }
 0x37e   :  { %v1986_v36 = vpop.f32.mrf.mxu0  ;;  %v2313_v43 = vpop.permute.xlu0 %2312  ;;  %v1876_v9 = vadd.f32 %v1875_v30, %v1850_v45 }
 0x37f   :  { %v1905_v16 = vpop.f32.mrf.mxu2 }
 0x380   :  { %v1906_v54 = vadd.f32 %v1905_v16, %v1876_v9 }
 0x382   :  { %v1930_v63 = vadd.f32 %v1929_v31, %v1906_v54 }
 0x385   :  { %v2022_v42 = vpop.f32.mrf.mxu1  ;;  %v2076_v37 = vpop.f32.mrf.mxu3 }
 0x386   :  { %v2023_v28 = vadd.f32 %v2022_v42, %v1986_v36 }
 0x387   :  { %v2050_v2 = vpop.f32.mrf.mxu2  ;;  %v2106_v50 = vpop.f32.mrf.mxu0 }
 0x388   :  { %v2051_v60 = vadd.f32 %v2050_v2, %v2023_v28 }
 0x38a   :  { %v2077_v57 = vadd.f32 %v2076_v37, %v2051_v60 }
 0x38c   :  { %v2107_v0 = vadd.f32 %v2106_v50, %v2077_v57 }
 0x38d   :  { %v2130_v48 = vpop.f32.mrf.mxu1  ;;  %v2194_v4 = vpop.f32.mrf.mxu3 }
 0x38e   :  { %v2131_v20 = vadd.f32 %v2130_v48, %v2107_v0 }
 0x38f   :  { %v2158_v40 = vpop.f32.mrf.mxu2  ;;  %v2222_v7 = vpop.f32.mrf.mxu0 }
 0x390   :  { %v2305_v34 = vadd.f32 %v2131_v20, %v1758_v35  ;;  %v2195_v49 = vadd.f32 %v2194_v4, %v2158_v40 }
 0x392   :  { %v2307_v46 = vadd.f32 %v2344_v32, %v2305_v34  ;;  %v2223_v10 = vadd.f32 %v2222_v7, %v2195_v49 }
 0x394   :  { %v2315_v1 = vadd.f32 %v2313_v43, %v2307_v46 }
 0x395   :  { %v2248_v11 = vpop.f32.mrf.mxu1  ;;  %v2302_v58 = vpop.f32.mrf.mxu3 }
 0x396   :  { %2317 = vst [vmem:[%s3111_s5] sm:$0xff] %v2315_v1  ;;  %v2249_v12 = vadd.f32 %v2248_v11, %v2223_v10 }
 0x397   :  { %v2278_v53 = vpop.f32.mrf.mxu2 }
 0x398   :  { %v2279_v13 = vadd.f32 %v2278_v53, %v2249_v12 }
 0x39a   :  { %v2303_v14 = vadd.f32 %v2302_v58, %v2279_v13 }
 0x39c   :  { %v2306_v52 = vadd.f32 %v2303_v14, %v1930_v63 }
 0x39e   :  { %v2308_v47 = vadd.f32 %v2345_v33, %v2306_v52 }
 0x3a0   :  { %v2316_v8 = vadd.f32 %v2313_v43, %v2308_v47 }
 0x3a2   :  { %2318 = vst [vmem:[%s3111_s5 + $0x8] sm:$0xff] %v2316_v8 }

</bundles_post_ra>
